<compile_context>
chip_gen: v7x
topology: tpu7x:2x2x1
jax: 0.10.0
libtpu: 0.0.40
codegen_flags: <defaults>
</compile_context>

<pallas_src>
import functools

import jax
import jax.numpy as jnp
from jax import lax
from jax.experimental import pallas as pl
from jax.experimental.pallas import tpu as pltpu


def _round_up(v, m):
    return ((v + m - 1) // m) * m


def _moments_kernel(idx_ref, x_ref, out_ref, acc_ref, cnt_ref, *, inf_val):
    """One (c, n) grid step.

    idx_ref: (1, TN)  int32   node -> graph id (padded nodes hold B_pad)
    x_ref:   (TN, TC) float32 node features for this (n, c) tile
    out_ref: (4, B_pad, TC)   float32 [mean, var, skew, kurt] slabs
    acc_ref: (B_pad, 4*TC)    float32 raw-moment sums  [S1 | S2 | S3 | S4]
    cnt_ref: (B_pad, 1)       float32 node counts per graph
    """
    n = pl.program_id(1)
    n_last = pl.num_programs(1) - 1
    b_pad = acc_ref.shape[0]
    tc = x_ref.shape[1]

    # ---- init accumulators at the start of the N reduction -------------
    @pl.when(n == 0)
    def _():
        acc_ref[...] = jnp.zeros_like(acc_ref)
        cnt_ref[...] = jnp.zeros_like(cnt_ref)

    # ---- build membership mask in-kernel (no dense one-hot in HBM) -----
    idx = idx_ref[...]                                        # (1, TN) int32
    gid = lax.broadcasted_iota(jnp.int32, (b_pad, idx.shape[1]), 0)
    mask = (gid == idx).astype(jnp.float32)                   # (B_pad, TN)

    # ---- fused raw-moment matmul:  [B,TN] @ [TN,4*TC] -------------------
    x = x_ref[...]                                            # (TN, TC) f32
    x2 = x * x
    x3 = x2 * x
    x4 = x2 * x2
    pows = jnp.concatenate([x, x2, x3, x4], axis=-1)          # (TN, 4*TC)

    acc_ref[...] += jnp.dot(mask, pows, preferred_element_type=jnp.float32)
    cnt_ref[...] += jnp.sum(mask, axis=1, keepdims=True)

    # ---- finalize: central moments from raw moments ---------------------
    @pl.when(n == n_last)
    def _():
        counts = cnt_ref[...]                                 # (B_pad, 1)
        # guard padded / empty graphs (counts == 0) against inf/nan
        # (exact divide; approx EUP reciprocal possible if tolerance allows)
        inv_n = 1.0 / jnp.maximum(counts, 1.0)

        acc = acc_ref[...]
        s1 = acc[:, 0 * tc:1 * tc]
        s2 = acc[:, 1 * tc:2 * tc]
        s3 = acc[:, 2 * tc:3 * tc]
        s4 = acc[:, 3 * tc:4 * tc]

        mean = s1 * inv_n
        e2 = s2 * inv_n
        e3 = s3 * inv_n
        e4 = s4 * inv_n

        m2 = mean * mean
        var = e2 - m2
        skew = e3 - 3.0 * mean * e2 + 2.0 * mean * m2
        m4 = e4 - 4.0 * mean * e3 + 6.0 * m2 * e2 - 3.0 * m2 * m2

        # clamp exactly like the reference (asymmetric: only > inf_val)
        skew = jnp.where(skew > inf_val, 0.0, skew)
        skew = jnp.where(jnp.isnan(skew), 0.0, skew)
        kurt = m4 - 3.0
        kurt = jnp.where(kurt > inf_val, -3.0, kurt)
        kurt = jnp.where(jnp.isnan(kurt), -3.0, kurt)

        out_ref[0, :, :] = mean
        out_ref[1, :, :] = var
        out_ref[2, :, :] = skew
        out_ref[3, :, :] = kurt


def statistical_moments_pallas(graph, batch_indices, moments_returned=4,
                               inf_val=1e15, num_graphs=None,
                               tile_n=512, tile_c=512):
    """JAX/Pallas equivalent of the PyTorch `statistical_moments` function.

    Pass `num_graphs` statically (Python int) to avoid a device->host sync.
    """
    assert moments_returned in (1, 2, 3, 4)
    x = jnp.asarray(graph, jnp.float32)
    batch_indices = jnp.asarray(batch_indices, jnp.int32)
    n_nodes, c = x.shape

    if num_graphs is None:
        # Fallback only: this forces a device->host sync; prefer passing
        # num_graphs explicitly so the whole call can be jit-pipelined.
        num_graphs = int(jax.device_get(jnp.max(batch_indices))) + 1
    b = int(num_graphs)

    # ---- padding / tiling (satisfy (8, 128) layout constraints) ---------
    b_pad = _round_up(b, 8)
    c_pad = _round_up(c, 128)
    if c_pad <= tile_c:
        tc = c_pad
    else:
        tc = tile_c                       # tile_c must be a multiple of 128
        c_pad = _round_up(c_pad, tc)
    if n_nodes <= tile_n:
        tn = _round_up(n_nodes, 8)
        n_pad = tn
    else:
        tn = tile_n                       # tile_n must be a multiple of 128
        n_pad = _round_up(n_nodes, tn)

    x_pad = jnp.pad(x, ((0, n_pad - n_nodes), (0, c_pad - c)))
    # padded nodes get graph id b_pad (out of range -> never matches the mask)
    idx_pad = jnp.pad(batch_indices, (0, n_pad - n_nodes),
                      constant_values=b_pad).reshape(1, n_pad)

    grid = (c_pad // tc, n_pad // tn)
    kernel = functools.partial(_moments_kernel, inf_val=float(inf_val))

    out4 = pl.pallas_call(
        kernel,
        out_shape=jax.ShapeDtypeStruct((4, b_pad, c_pad), jnp.float32),
        grid_spec=pltpu.PrefetchScalarGridSpec(
            num_scalar_prefetch=0,
            grid=grid,
            in_specs=[
                pl.BlockSpec((1, tn), lambda ci, ni: (0, ni)),    # batch ids
                pl.BlockSpec((tn, tc), lambda ci, ni: (ni, ci)),  # features
            ],
            out_specs=pl.BlockSpec((4, b_pad, tc), lambda ci, ni: (0, 0, ci)),
            scratch_shapes=[
                pltpu.VMEM((b_pad, 4 * tc), jnp.float32),  # raw-moment sums
                pltpu.VMEM((b_pad, 1), jnp.float32),       # node counts
            ],
        ),
        compiler_params=pltpu.CompilerParams(
            dimension_semantics=("parallel", "arbitrary")),
    )(idx_pad, x_pad)

    # trim padding, reorder to [B, moments_returned * C]  (wrapper glue)
    out = out4[:moments_returned, :b, :c]               # (m, B, C)
    out = jnp.transpose(out, (1, 0, 2)).reshape(b, moments_returned * c)
    return out


class Aggregate:
    """Mirror of the PyTorch Aggregate module (no learnable parameters)."""

    def __init__(self, aggregation_method: str = "statistical_moments"):
        self.aggregation_method = aggregation_method

    def __call__(self, *args, **kwargs):
        if self.aggregation_method == "statistical_moments":
            return statistical_moments_pallas(*args, **kwargs)
        raise ValueError("unsupported aggregation_method")


def _reference_jax(graph, batch_indices, moments_returned=4, inf_val=1e15):
    """Pure-JAX two-pass reference for verification (eager, small sizes)."""
    x = jnp.asarray(graph, jnp.float32)
    b = int(jnp.max(batch_indices)) + 1
    outs = []
    for g in range(b):
        mask = batch_indices == g
        data = x[mask]                                   # [n_g, C]
        mean = jnp.mean(data, axis=0)
        d = data - mean[None, :]
        var = jnp.mean(d ** 2, axis=0)
        skew = jnp.mean(d ** 3, axis=0)
        skew = jnp.where(jnp.isnan(skew) | (skew > inf_val), 0.0, skew)
        kurt = jnp.mean(d ** 4, axis=0) - 3.0
        kurt = jnp.where(jnp.isnan(kurt) | (kurt > inf_val), -3.0, kurt)
        outs.append(jnp.concatenate([mean, var, skew, kurt])
                    [: moments_returned * x.shape[1]])
    return jnp.stack(outs, axis=0)


if __name__ == "__main__":
    key = jax.random.PRNGKey(0)
    N, C, B = 16, 8, 2
    x = jax.random.normal(key, (N, C), dtype=jnp.float32)
    # interleaved graph assignment (order within a graph is irrelevant)
    batch_indices = jnp.array([0, 1] * (N // 2), dtype=jnp.int32)

    agg = Aggregate("statistical_moments")
    out = agg(x, batch_indices, moments_returned=4, num_graphs=B)
    out = jax.block_until_ready(out)

    ref = _reference_jax(x, batch_indices, moments_returned=4)
    assert out.shape == (B, 4 * C), out.shape
    assert jnp.allclose(out, ref, atol=1e-4, rtol=1e-4), (out, ref)

    print("KERNEL_OK")
</pallas_src>

<mosaic_0001>
module attributes {stable_mosaic.version = 11 : i64} {
  func.func @_moments_kernel(%arg0: i32, %arg1: i32, %arg2: memref<1x16xi32, #tpu.memory_space<vmem>>, %arg3: memref<16x128xf32, #tpu.memory_space<vmem>>, %arg4: memref<4x8x128xf32, #tpu.memory_space<vmem>>, %arg5: memref<8x512xf32, #tpu.memory_space<vmem>>, %arg6: memref<8x1xf32, #tpu.memory_space<vmem>>) attributes {dimension_semantics = [#tpu.dimension_semantics<parallel>, #tpu.dimension_semantics<arbitrary>], iteration_bounds = array<i64: 1, 1>, scalar_prefetch = 0 : i64, scratch_operands = 2 : i64, tpu.core_type = #tpu.core_type<tc>, window_params = [{transform_indices = @transform_0, window_bounds = array<i64: 1, 16>}, {transform_indices = @transform_1, window_bounds = array<i64: 16, 128>}, {transform_indices = @transform_2, window_bounds = array<i64: 4, 8, 128>}]} {
    %c0_i32 = arith.constant 0 : i32
    %0 = arith.cmpi eq, %arg1, %c0_i32 : i32
    %1 = arith.extui %0 : i1 to i32
    %c0_i32_0 = arith.constant 0 : i32
    %2 = arith.cmpi ne, %1, %c0_i32_0 : i32
    scf.if %2 {
      %cst_15 = arith.constant 0.000000e+00 : f32
      %26 = vector.broadcast %cst_15 : f32 to vector<8x512xf32>
      %c0_16 = arith.constant 0 : index
      %c0_17 = arith.constant 0 : index
      %27 = vector.load %arg5[%c0_16, %c0_17] : memref<8x512xf32, #tpu.memory_space<vmem>>, vector<8x512xf32>
      tpu.vector_store %arg5[%c0_16, %c0_17], %26 {strides = array<i32>} : memref<8x512xf32, #tpu.memory_space<vmem>>, vector<8x512xf32>,
      %cst_18 = arith.constant 0.000000e+00 : f32
      %28 = vector.broadcast %cst_18 : f32 to vector<8x1xf32>
      %c0_19 = arith.constant 0 : index
      %c0_20 = arith.constant 0 : index
      %29 = vector.load %arg6[%c0_19, %c0_20] : memref<8x1xf32, #tpu.memory_space<vmem>>, vector<8x1xf32>
      tpu.vector_store %arg6[%c0_19, %c0_20], %28 {strides = array<i32>} : memref<8x1xf32, #tpu.memory_space<vmem>>, vector<8x1xf32>,
    } else {
    }
    %c0 = arith.constant 0 : index
    %c0_1 = arith.constant 0 : index
    %3 = vector.load %arg2[%c0, %c0_1] : memref<1x16xi32, #tpu.memory_space<vmem>>, vector<1x16xi32>
    %4 = tpu.iota {dimensions = array<i32: 0>} : vector<8x16xi32>
    %5 = vector.broadcast %3 : vector<1x16xi32> to vector<8x16xi32>
    %6 = arith.cmpi eq, %4, %5 : vector<8x16xi32>
    %7 = arith.extui %6 : vector<8x16xi1> to vector<8x16xi32>
    %8 = arith.sitofp %7 : vector<8x16xi32> to vector<8x16xf32>
    %c0_2 = arith.constant 0 : index
    %c0_3 = arith.constant 0 : index
    %9 = vector.load %arg3[%c0_2, %c0_3] : memref<16x128xf32, #tpu.memory_space<vmem>>, vector<16x128xf32>
    %10 = arith.mulf %9, %9 : vector<16x128xf32>
    %11 = arith.mulf %10, %9 : vector<16x128xf32>
    %12 = arith.mulf %10, %10 : vector<16x128xf32>
    %13 = tpu.concatenate %9, %10, %11, %12 in 1 : vector<16x128xf32>, vector<16x128xf32>, vector<16x128xf32>, vector<16x128xf32> -> vector<16x512xf32>
    %c0_4 = arith.constant 0 : index
    %c0_5 = arith.constant 0 : index
    %14 = vector.load %arg5[%c0_4, %c0_5] : memref<8x512xf32, #tpu.memory_space<vmem>>, vector<8x512xf32>
    %cst = arith.constant dense<0.000000e+00> : vector<8x512xf32>
    %15 = tpu.matmul %8, %13, %cst {dimension_numbers = #tpu.dot_dimension_numbers<[1], [0], [0], [1], [0, 0, 1, 1], [], []>} : vector<8x16xf32>, vector<16x512xf32>, vector<8x512xf32> -> vector<8x512xf32>
    %16 = arith.addf %14, %15 : vector<8x512xf32>
    %c0_6 = arith.constant 0 : index
    %c0_7 = arith.constant 0 : index
    %17 = vector.load %arg5[%c0_6, %c0_7] : memref<8x512xf32, #tpu.memory_space<vmem>>, vector<8x512xf32>
    tpu.vector_store %arg5[%c0_6, %c0_7], %16 {strides = array<i32>} : memref<8x512xf32, #tpu.memory_space<vmem>>, vector<8x512xf32>,
    %c0_8 = arith.constant 0 : index
    %c0_9 = arith.constant 0 : index
    %18 = vector.load %arg6[%c0_8, %c0_9] : memref<8x1xf32, #tpu.memory_space<vmem>>, vector<8x1xf32>
    %cst_10 = arith.constant dense<0.000000e+00> : vector<8xf32>
    %19 = vector.multi_reduction <add>, %8, %cst_10 [1] : vector<8x16xf32> to vector<8xf32>
    %20 = vector.shape_cast %19 : vector<8xf32> to vector<8x1xf32>
    %21 = arith.addf %18, %20 : vector<8x1xf32>
    %c0_11 = arith.constant 0 : index
    %c0_12 = arith.constant 0 : index
    %22 = vector.load %arg6[%c0_11, %c0_12] : memref<8x1xf32, #tpu.memory_space<vmem>>, vector<8x1xf32>
    tpu.vector_store %arg6[%c0_11, %c0_12], %21 {strides = array<i32>} : memref<8x1xf32, #tpu.memory_space<vmem>>, vector<8x1xf32>,
    %c0_i32_13 = arith.constant 0 : i32
    %23 = arith.cmpi eq, %arg1, %c0_i32_13 : i32
    %24 = arith.extui %23 : i1 to i32
    %c0_i32_14 = arith.constant 0 : i32
    %25 = arith.cmpi ne, %24, %c0_i32_14 : i32
    scf.if %25 {
      %c0_15 = arith.constant 0 : index
      %c0_16 = arith.constant 0 : index
      %26 = vector.load %arg6[%c0_15, %c0_16] : memref<8x1xf32, #tpu.memory_space<vmem>>, vector<8x1xf32>
      %cst_17 = arith.constant 1.000000e+00 : f32
      %27 = vector.broadcast %cst_17 : f32 to vector<8x1xf32>
      %28 = arith.maximumf %26, %27 : vector<8x1xf32>
      %cst_18 = arith.constant 1.000000e+00 : f32
      %29 = vector.broadcast %cst_18 : f32 to vector<8x1xf32>
      %30 = arith.divf %29, %28 : vector<8x1xf32>
      %c0_19 = arith.constant 0 : index
      %c0_20 = arith.constant 0 : index
      %31 = vector.load %arg5[%c0_19, %c0_20] : memref<8x512xf32, #tpu.memory_space<vmem>>, vector<8x512xf32>
      %32 = vector.extract_strided_slice %31 {offsets = [0, 0], sizes = [8, 128], strides = [1, 1]} : vector<8x512xf32> to vector<8x128xf32>
      %33 = vector.extract_strided_slice %31 {offsets = [0, 128], sizes = [8, 128], strides = [1, 1]} : vector<8x512xf32> to vector<8x128xf32>
      %34 = vector.extract_strided_slice %31 {offsets = [0, 256], sizes = [8, 128], strides = [1, 1]} : vector<8x512xf32> to vector<8x128xf32>
      %35 = vector.extract_strided_slice %31 {offsets = [0, 384], sizes = [8, 128], strides = [1, 1]} : vector<8x512xf32> to vector<8x128xf32>
      %36 = vector.broadcast %30 : vector<8x1xf32> to vector<8x128xf32>
      %37 = arith.mulf %32, %36 : vector<8x128xf32>
      %38 = vector.broadcast %30 : vector<8x1xf32> to vector<8x128xf32>
      %39 = arith.mulf %33, %38 : vector<8x128xf32>
      %40 = vector.broadcast %30 : vector<8x1xf32> to vector<8x128xf32>
      %41 = arith.mulf %34, %40 : vector<8x128xf32>
      %42 = vector.broadcast %30 : vector<8x1xf32> to vector<8x128xf32>
      %43 = arith.mulf %35, %42 : vector<8x128xf32>
      %44 = arith.mulf %37, %37 : vector<8x128xf32>
      %45 = arith.subf %39, %44 : vector<8x128xf32>
      %cst_21 = arith.constant 3.000000e+00 : f32
      %46 = vector.broadcast %cst_21 : f32 to vector<8x128xf32>
      %47 = arith.mulf %46, %37 : vector<8x128xf32>
      %48 = arith.mulf %47, %39 : vector<8x128xf32>
      %49 = arith.subf %41, %48 : vector<8x128xf32>
      %cst_22 = arith.constant 2.000000e+00 : f32
      %50 = vector.broadcast %cst_22 : f32 to vector<8x128xf32>
      %51 = arith.mulf %50, %37 : vector<8x128xf32>
      %52 = arith.mulf %51, %44 : vector<8x128xf32>
      %53 = arith.addf %49, %52 : vector<8x128xf32>
      %cst_23 = arith.constant 4.000000e+00 : f32
      %54 = vector.broadcast %cst_23 : f32 to vector<8x128xf32>
      %55 = arith.mulf %54, %37 : vector<8x128xf32>
      %56 = arith.mulf %55, %41 : vector<8x128xf32>
      %57 = arith.subf %43, %56 : vector<8x128xf32>
      %cst_24 = arith.constant 6.000000e+00 : f32
      %58 = vector.broadcast %cst_24 : f32 to vector<8x128xf32>
      %59 = arith.mulf %58, %44 : vector<8x128xf32>
      %60 = arith.mulf %59, %39 : vector<8x128xf32>
      %61 = arith.addf %57, %60 : vector<8x128xf32>
      %cst_25 = arith.constant 3.000000e+00 : f32
      %62 = vector.broadcast %cst_25 : f32 to vector<8x128xf32>
      %63 = arith.mulf %62, %44 : vector<8x128xf32>
      %64 = arith.mulf %63, %44 : vector<8x128xf32>
      %65 = arith.subf %61, %64 : vector<8x128xf32>
      %cst_26 = arith.constant 9.99999986E+14 : f32
      %66 = vector.broadcast %cst_26 : f32 to vector<8x128xf32>
      %67 = arith.cmpf ogt, %53, %66 : vector<8x128xf32>
      %cst_27 = arith.constant 0.000000e+00 : f32
      %68 = vector.broadcast %cst_27 : f32 to vector<8x128xf32>
      %69 = arith.select %67, %68, %53 : vector<8x128xi1>, vector<8x128xf32>
      %70 = arith.cmpf one, %69, %69 : vector<8x128xf32>
      %cst_28 = arith.constant 0.000000e+00 : f32
      %71 = vector.broadcast %cst_28 : f32 to vector<8x128xf32>
      %72 = arith.select %70, %71, %69 : vector<8x128xi1>, vector<8x128xf32>
      %cst_29 = arith.constant 3.000000e+00 : f32
      %73 = vector.broadcast %cst_29 : f32 to vector<8x128xf32>
      %74 = arith.subf %65, %73 : vector<8x128xf32>
      %cst_30 = arith.constant 9.99999986E+14 : f32
      %75 = vector.broadcast %cst_30 : f32 to vector<8x128xf32>
      %76 = arith.cmpf ogt, %74, %75 : vector<8x128xf32>
      %cst_31 = arith.constant -3.000000e+00 : f32
      %77 = vector.broadcast %cst_31 : f32 to vector<8x128xf32>
      %78 = arith.select %76, %77, %74 : vector<8x128xi1>, vector<8x128xf32>
      %79 = arith.cmpf one, %78, %78 : vector<8x128xf32>
      %cst_32 = arith.constant -3.000000e+00 : f32
      %80 = vector.broadcast %cst_32 : f32 to vector<8x128xf32>
      %81 = arith.select %79, %80, %78 : vector<8x128xi1>, vector<8x128xf32>
      %c0_33 = arith.constant 0 : index
      %c0_34 = arith.constant 0 : index
      %c0_35 = arith.constant 0 : index
      %82 = vector.load %arg4[%c0_33, %c0_34, %c0_35] : memref<4x8x128xf32, #tpu.memory_space<vmem>>, vector<1x8x128xf32>
      %83 = vector.shape_cast %82 : vector<1x8x128xf32> to vector<8x128xf32>
      %84 = vector.shape_cast %37 : vector<8x128xf32> to vector<1x8x128xf32>
      tpu.vector_store %arg4[%c0_33, %c0_34, %c0_35], %84 {strides = array<i32>} : memref<4x8x128xf32, #tpu.memory_space<vmem>>, vector<1x8x128xf32>,
      %c1 = arith.constant 1 : index
      %c0_36 = arith.constant 0 : index
      %c0_37 = arith.constant 0 : index
      %85 = vector.load %arg4[%c1, %c0_36, %c0_37] : memref<4x8x128xf32, #tpu.memory_space<vmem>>, vector<1x8x128xf32>
      %86 = vector.shape_cast %85 : vector<1x8x128xf32> to vector<8x128xf32>
      %87 = vector.shape_cast %45 : vector<8x128xf32> to vector<1x8x128xf32>
      tpu.vector_store %arg4[%c1, %c0_36, %c0_37], %87 {strides = array<i32>} : memref<4x8x128xf32, #tpu.memory_space<vmem>>, vector<1x8x128xf32>,
      %c2 = arith.constant 2 : index
      %c0_38 = arith.constant 0 : index
      %c0_39 = arith.constant 0 : index
      %88 = vector.load %arg4[%c2, %c0_38, %c0_39] : memref<4x8x128xf32, #tpu.memory_space<vmem>>, vector<1x8x128xf32>
      %89 = vector.shape_cast %88 : vector<1x8x128xf32> to vector<8x128xf32>
      %90 = vector.shape_cast %72 : vector<8x128xf32> to vector<1x8x128xf32>
      tpu.vector_store %arg4[%c2, %c0_38, %c0_39], %90 {strides = array<i32>} : memref<4x8x128xf32, #tpu.memory_space<vmem>>, vector<1x8x128xf32>,
      %c3 = arith.constant 3 : index
      %c0_40 = arith.constant 0 : index
      %c0_41 = arith.constant 0 : index
      %91 = vector.load %arg4[%c3, %c0_40, %c0_41] : memref<4x8x128xf32, #tpu.memory_space<vmem>>, vector<1x8x128xf32>
      %92 = vector.shape_cast %91 : vector<1x8x128xf32> to vector<8x128xf32>
      %93 = vector.shape_cast %81 : vector<8x128xf32> to vector<1x8x128xf32>
      tpu.vector_store %arg4[%c3, %c0_40, %c0_41], %93 {strides = array<i32>} : memref<4x8x128xf32, #tpu.memory_space<vmem>>, vector<1x8x128xf32>,
    } else {
    }
    return
  }
  func.func @transform_0(%arg0: i32, %arg1: i32) -> (i32, i32) {
    %c0_i32 = arith.constant 0 : i32
    %c0_i32_0 = arith.constant 0 : i32
    return %c0_i32, %arg1 : i32, i32
  }
  func.func @transform_1(%arg0: i32, %arg1: i32) -> (i32, i32) {
    %c0_i32 = arith.constant 0 : i32
    return %arg1, %arg0 : i32, i32
  }
  func.func @transform_2(%arg0: i32, %arg1: i32) -> (i32, i32, i32) {
    %c0_i32 = arith.constant 0 : i32
    %c0_i32_0 = arith.constant 0 : i32
    %c0_i32_1 = arith.constant 0 : i32
    return %c0_i32, %c0_i32_0, %arg0 : i32, i32, i32
  }
}

</mosaic_0001>

<bundles_post_ra>
// kernel: tpu_custom_call.1
= control target key start
LH: loop header
LB: loop body
LE: loop exit
PB: predicated region body
PF: predicated region fallthrough
CT: control target
= control target key end

     0   :  { %7 = vsyncpa [#allocation5], 0  ;;  %s473_s0 = inlined_call_operand.hbm [shape: s32[1,16], index: 0, kind: input, shape index: {}]   ;;  %s474_s1 = inlined_call_operand.hbm [shape: f32[16,128], index: 1, kind: input, shape index: {}]   ;;  %s475_s2 = inlined_call_operand.hbm [shape: f32[4,8,128], index: 2, kind: output, shape index: {}]  }
   0x1   :  { %8 = vsyncpa [#allocation8], 0 }
   0x2   :  { %9 = vsyncpa [#allocation6], 0  ;;  %s397_s9 = smov [#allocation4]   ;;  %s398_s11 = smov [#allocation7]  }
   0x3   :  { %s16_s10 = sshll.u32 %s397_s9, 4  ;;  %s25_s12 = sshll.u32 %s398_s11, 4  ;;  %s17_s10 = int_to_ptr.vmem [resolvable:$true] %s16_s10  ;;  %s419_s12 = int_to_ptr.vmem [resolvable:$true] %s25_s12 }
   0x4   :  { %s325_s15 = scalar_lea.hbm %s473_s0, 16 }
   0x5   :  { %p326_p0 = scmp.ne.s32.totalorder %s473_s0, %s325_s15  ;;  %p329_p1 = scmp.lt.u32.totalorder %s325_s15, %s473_s0 }
   0x7   :  { %p331_p2 = pnand %p329_p1, %p326_p0 }
   0x9   :  { %334 = shalt.err (!%p331_p2)
}
   0xa   :  { %s335_s20 = scalar_lea.vmem %s17_s10, 16  ;;  %s339_s21 = scalar_lea.vmem %s17_s10, 32 }
   0xb   :  { %p336_p3 = scmp.ne.s32.totalorder %s17_s10, %s335_s20  ;;  %p340_p4 = scmp.lt.s32.totalorder %s17_s10, %s17_s10 }
   0xc   :  { %p341_p5 = scmp.lt.s32.totalorder %s339_s21, %s335_s20 }
   0xe   :  { %p342_p6 = por %p341_p5, %p340_p4 }
  0x10   :  { %p343_p7 = pnand %p342_p6, %p336_p3 }
  0x12   :  { %346 = shalt.err (!%p343_p7)
}
  0x13   :  { %19 = dma.hbm_to_vmem [thread:$0]  %s473_s0, 16, %s17_s10, [#allocation5]  }
  0x14   :  { %s347_s26 = scalar_lea.hbm %s474_s1, 256 }
  0x15   :  { %p348_p8 = scmp.ne.s32.totalorder %s474_s1, %s347_s26  ;;  %p351_p9 = scmp.lt.u32.totalorder %s347_s26, %s474_s1 }
  0x17   :  { %p353_p10 = pnand %p351_p9, %p348_p8 }
  0x19   :  { %356 = shalt.err (!%p353_p10)
}
  0x1a   :  { %s357_s3 = scalar_lea.vmem %s419_s12, 256  ;;  %p362_p12 = scmp.lt.s32.totalorder %s419_s12, %s419_s12 }
  0x1b   :  { %p358_p11 = scmp.ne.s32.totalorder %s419_s12, %s357_s3  ;;  %p363_p13 = scmp.lt.s32.totalorder %s357_s3, %s357_s3 }
  0x1d   :  { %p364_p0 = por %p363_p13, %p362_p12 }
  0x1f   :  { %p365_p1 = pnand %p364_p0, %p358_p11 }
  0x21   :  { %368 = shalt.err (!%p365_p1)
}
  0x22   :  { %s399_s0 = smov 128   ;;  %s400_s4 = smov 8  }
  0x23   :  { %31 = dma.hbm_to_vmem [thread:$0]  %s474_s1, 256, %s419_s12, [#allocation8], %s399_s0, %s399_s0, %s400_s4  }
  0x24   :  { %391 = dma.done.wait [#allocation5], 16  }
  0x25   :  { %392 = vsyncadd [#allocation5], 4294967280 }
  0x26   :  { %393 = dma.done.wait [#allocation8], 256  }
  0x27   :  { %394 = vsyncadd [#allocation8], 4294967040  ;;  %vm46_vm0 = vcmask 7168   ;;  %v49_v0 = vlaneseq  ;;  %v401_v1 = vmov 0.0   ;;  %v302_v3 = vld [vmem:[#allocation4] ss:$0 sm:$0xff] }
  0x28   :  { %47 = vst.msk [vmem:[#allocation3] sm:$0xff] %vm46_vm0, %v401_v1  ;;  %138 = vmatprep.mubr.f32.mxu0 %v401_v1  ;;  %209 = vmatprep.mubr.f32.mxu1 %v401_v1  ;;  %vm70_vm1 = vcmask 130048   ;;  %v58_v4 = vld [vmem:[#allocation7] sm:$0xff]  ;;  %v59_v5 = vld [vmem:[#allocation7 + $0x8] sm:$0xff]  ;;  %v402_v18 = vmov 0   ;;  %s403_s1 = smov [#allocation9]  }
  0x29   :  { %v50_v2 = vshrl.u32 %v49_v0, 7  ;;  %v60_v6 = vmul.f32 %v58_v4, %v58_v4  ;;  %v61_v7 = vmul.f32 %v59_v5, %v59_v5  ;;  %v309_v9 = vpack.c.bf16 %v59_v5, %v58_v4  ;;  %322 = vset.pattern.permute.xlu0 %v402_v18  ;;  %s289_s7 = sshll.u32 %s403_s1, 4  ;;  %s290_s7 = int_to_ptr.vmem [resolvable:$true] %s289_s7 }
  0x2a   :  { %s369_s8 = scalar_lea.vmem %s290_s7, 512  ;;  %p374_p3 = scmp.lt.s32.totalorder %s290_s7, %s290_s7 }
  0x2b   :  { %vm55_vm2 = vcmp.eq.s32.totalorder %v50_v2, %v302_v3  ;;  %v307_v11 = vpack.c.bf16 %v61_v7, %v60_v6  ;;  %v64_v12 = vmul.f32 %v60_v6, %v60_v6  ;;  %v65_v13 = vmul.f32 %v61_v7, %v61_v7  ;;  %p370_p2 = scmp.ne.s32.totalorder %s290_s7, %s369_s8  ;;  %p375_p4 = scmp.lt.s32.totalorder %s369_s8, %s369_s8 }
  0x2c   :  { %v303_v8 = vsel %vm55_vm2, 1.0, %v401_v1  ;;  %v62_v14 = vmul.f32 %v60_v6, %v58_v4  ;;  %v63_v15 = vmul.f32 %v61_v7, %v59_v5 }
  0x2d   :  { %v225_v10 = vsel %vm70_vm1, %v303_v8, 0.0  ;;  %308 = vmatprep.subr.bf16.mxu0 %v307_v11  ;;  %v311_v16 = vpack.c.bf16 %v65_v13, %v64_v12  ;;  %p376_p5 = por %p375_p4, %p374_p3 }
  0x2e   :  { %226 = vadd.xlane.f32.xlu0 %v225_v10  ;;  %310 = vmatpush1.bf16.msra.mxu0 %v309_v9  ;;  %v313_v17 = vpack.c.bf16 %v63_v15, %v62_v14 }
  0x2f   :  { %312 = vmatprep.subr.bf16.mxu1 %v311_v16  ;;  %v224_v19 = vld [vmem:[#allocation3] sm:$0xff]  ;;  %p377_p6 = pnand %p376_p5, %p370_p2 }
  0x30   :  { %314 = vmatpush1.bf16.msra.mxu1 %v313_v17 }
  0x31   :  { %304 = vmatmul.mubr.msk.f32.vlgmr.msra.gmra.mrb[0].mxu0 %vm70_vm1, %v303_v8 }
  0x33   :  { %305 = vmatmul.mubr.msk.f32.vlgmr.msra.gmra.mrb[0].mxu1 %vm70_vm1, %v303_v8 }
  0xbb   :  { %v227_v20 = vpop.xlane.xlu0 %226 }
  0xbc   :  { %v228_v21 = vadd.f32 %v227_v20, %v224_v19 }
  0xbe   :  { %230 = vst.msk [vmem:[#allocation3] sm:$0xff] %vm46_vm0, %v228_v21 }
  0xc5   :  { %v234_v22 = vld [vmem:[#allocation3] sm:$0xff] }
  0xc6   :  { %v235_v23 = vmax.f32 %v234_v22, 1.0 }
  0xc8   :  { %323 = vrcp.f32 %v235_v23 }
  0xd2   :  { %v324_v24 = vpop.eup %323 }
  0xd3   :  { %244 = vperm.xlu0 %322, %v324_v24  }
 0x104   :  { %v140_v25 = vpop.f32.mrb[0].mxu0 }
 0x105   :  { %v142_v26 = vpop.f32.mrb[1].mxu0 }
 0x106   :  { %v211_v27 = vpop.f32.mrb[0].mxu1 }
 0x107   :  { %v213_v28 = vpop.f32.mrb[1].mxu1 }
 0x152   :  { %v245_v29 = vpop.permute.xlu0 %244 }
 0x153   :  { %v247_v30 = vmul.f32 %v245_v29, %v140_v25  ;;  %v248_v31 = vmul.f32 %v245_v29, %v142_v26  ;;  %v249_v32 = vmul.f32 %v245_v29, %v211_v27  ;;  %v250_v37 = vmul.f32 %v245_v29, %v213_v28 }
 0x155   :  { %v251_v33 = vmul.f32 %v247_v30, %v247_v30  ;;  %v253_v34 = vmul.f32 3.0, %v247_v30  ;;  %v256_v35 = vmul.f32 2.0, %v247_v30  ;;  %v259_v36 = vmul.f32 4.0, %v247_v30  ;;  %277 = vst [vmem:[#allocation9] sm:$0xff] %v247_v30 }
 0x157   :  { %v252_v38 = vsub.f32 %v248_v31, %v251_v33  ;;  %v254_v39 = vmul.f32 %v253_v34, %v248_v31  ;;  %v260_v40 = vmul.f32 %v259_v36, %v249_v32  ;;  %v262_v41 = vmul.f32 6.0, %v251_v33 }
 0x158   :  { %v265_v42 = vmul.f32 3.0, %v251_v33  ;;  %v257_v44 = vmul.f32 %v256_v35, %v251_v33 }
 0x159   :  { %v255_v43 = vsub.f32 %v249_v32, %v254_v39  ;;  %v261_v45 = vsub.f32 %v250_v37, %v260_v40  ;;  %279 = vst [vmem:[#allocation9 + $0x8] sm:$0xff] %v252_v38  ;;  %v263_v46 = vmul.f32 %v262_v41, %v248_v31 }
 0x15a   :  { %v266_v49 = vmul.f32 %v265_v42, %v251_v33 }
 0x15b   :  { %v258_v47 = vadd.f32 %v257_v44, %v255_v43  ;;  %v264_v48 = vadd.f32 %v263_v46, %v261_v45 }
 0x15d   :  { %vm268_vm3 = vcmp.gt.f32.partialorder %v258_v47, 1e+15  ;;  %v267_v50 = vsub.f32 %v264_v48, %v266_v49 }
 0x15e   :  { %v269_v51 = vsel %vm268_vm3, 0.0, %v258_v47 }
 0x15f   :  { %vm270_vm4 = vcmp.ne.f32.partialorder %v269_v51, %v269_v51  ;;  %v306_v52 = vadd.f32 -3.0, %v267_v50 }
 0x160   :  { %v271_v53 = vsel %vm270_vm4, 0.0, %v269_v51 }
 0x161   :  { %281 = vst [vmem:[#allocation9 + $0x10] sm:$0xff] %v271_v53  ;;  %vm273_vm5 = vcmp.gt.f32.partialorder %v306_v52, 1e+15 }
 0x162   :  { %v274_v54 = vsel %vm273_vm5, -3.0, %v306_v52 }
 0x163   :  { %vm275_vm6 = vcmp.ne.f32.partialorder %v274_v54, %v274_v54 }
 0x164   :  { %v276_v55 = vsel %vm275_vm6, -3.0, %v274_v54 }
 0x165   :  { %283 = vst [vmem:[#allocation9 + $0x18] sm:$0xff] %v276_v55 }
 0x166   :  { %380 = shalt.err (!%p377_p6)
}
 0x167   :  { %s381_s11 = scalar_lea.hbm %s475_s2, 512 }
 0x168   :  { %p382_p7 = scmp.ne.s32.totalorder %s475_s2, %s381_s11  ;;  %p385_p8 = scmp.lt.u32.totalorder %s381_s11, %s475_s2 }
 0x16a   :  { %p387_p9 = pnand %p385_p8, %p382_p7 }
 0x16c   :  { %390 = shalt.err (!%p387_p9)
}
 0x16d   :  { %295 = dma.vmem_to_hbm [thread:$0]  %s290_s7, 512, %s475_s2, [#allocation6], %s399_s0, %s399_s0, %s400_s4  }
 0x16e   :  { %395 = dma.done.wait [#allocation6], 512  }
 0x16f   :  { %396 = vsyncadd [#allocation6], 4294966784 }
 0x170   :  { %299 = vsyncpa [#allocation5], 1 }
 0x171   :  { %300 = vsyncpa [#allocation8], 1 }
 0x172   :  { %301 = vsyncpa [#allocation6], 1 }

</bundles_post_ra>
